<compile_context>
chip_gen: v7x
topology: tpu7x:2x2x1
jax: 0.10.0
libtpu: 0.0.40
codegen_flags: <defaults>
</compile_context>

<pallas_src>
import jax
import jax.numpy as jnp
from jax import lax
from jax.experimental import pallas as pl
from jax.experimental.pallas import tpu as pltpu


def _round_up(a, m):
    return -(-a // m) * m


def _sublane_tile(itemsize):
    # Native sublane tiling of the second-to-last dim per element width.
    return {4: 8, 2: 16, 1: 32}.get(itemsize, 8)


def _make_tp_kernel(n_pixels, tile_n, steps_per_part, needs_mask):
    def kernel(logits_ref, targets_ref, tp_ref, acc_ref):
        p = pl.program_id(0)
        s = pl.program_id(1)

        @pl.when(s == 0)
        def _init():
            acc_ref[...] = jnp.zeros_like(acc_ref)

        x = logits_ref[...].astype(jnp.float32)             # (B, C, TN)
        B, C, TN = x.shape

        # Unnormalized, max-shifted softmax pieces (never normalize the full
        # (B, C, TN) tensor; the exact divide runs on the small (B, TN)).
        m = jnp.max(x, axis=1, keepdims=True)               # (B, 1, TN)
        e = jnp.exp(x - m)                                   # (B, C, TN)
        z = jnp.sum(e, axis=1)                               # (B, TN)

        # Target-class numerator via broadcast compare (no (B,C,TN) iota
        # materialized per step; targets upcast in-vreg, DMA stays narrow).
        t = targets_ref[...].astype(jnp.int32)               # (B, TN)
        cls = lax.broadcasted_iota(jnp.int32, (1, C, TN), 1)
        num = jnp.sum(jnp.where(t[:, None, :] == cls, e, 0.0), axis=1)

        contrib = num / z                                     # per-pixel TP
        if needs_mask:
            # Zero out lanes past the true pixel count (partial last tile).
            off = (p * steps_per_part + s) * tile_n
            lane = lax.broadcasted_iota(jnp.int32, (B, TN), 1)
            contrib = jnp.where(off + lane < n_pixels, contrib, 0.0)
        acc_ref[...] += contrib

        @pl.when(s == pl.num_programs(1) - 1)
        def _finalize():
            tp_ref[0, 0] = jnp.sum(acc_ref[...])

    return kernel


def focal_tversky_loss(logits, targets, *, alpha=0.3, beta=0.7,
                       gamma=4.0 / 3.0, epsilon=1.0):
    """logits: [B, C, H, W] float; targets: [B, H, W] integer class labels."""
    B, C, H, W = logits.shape
    N = H * W

    x = logits.reshape(B, C, N)            # keep input dtype through the DMA
    t = targets.reshape(B, N)
    if not jnp.issubdtype(t.dtype, jnp.integer):
        t = t.astype(jnp.int32)

    in_item = x.dtype.itemsize
    t_item = t.dtype.itemsize

    # ---- chip info --------------------------------------------------------
    try:
        vmem_cap = int(pltpu.get_tpu_info().vmem_capacity_bytes)
    except Exception:
        vmem_cap = 64 << 20
    # 64 MiB VMEM per TensorCore <=> two TensorCores per chip (v7x-class).
    want_partitions = 2 if vmem_cap <= (64 << 20) else 1

    # ---- byte-budgeted pixel tile -----------------------------------------
    Cp = _round_up(C, _sublane_tile(in_item))   # sublane-padded class rows
    Bt = _round_up(B, _sublane_tile(t_item))    # sublane-padded target rows
    B8 = _round_up(B, 8)                        # f32 accumulator rows

    per_lane = (2 * B * Cp * in_item            # double-buffered logits tiles
                + 2 * Bt * t_item               # double-buffered target tiles
                + B8 * 4                        # per-pixel TP accumulator
                + 2 * B * Cp * 4)               # in-kernel f32 intermediates

    total_budget = min(int(0.75 * vmem_cap), 48 << 20)
    slab_budget = 8 << 20                       # single logits block target
    tile_n = min(slab_budget // max(1, B * Cp * in_item),
                 total_budget // max(1, per_lane))
    if tile_n >= N:
        tile_n = N                              # full-extent block (always ok)
    else:
        tile_n = max(128, (tile_n // 128) * 128)

    n_tiles = pl.cdiv(N, tile_n)
    P = want_partitions if (n_tiles >= want_partitions
                            and n_tiles % want_partitions == 0) else 1
    S = n_tiles // P
    needs_mask = (N % tile_n) != 0

    vmem_need = per_lane * _round_up(tile_n, 128)
    vmem_limit = int(min(max(vmem_need + (8 << 20), 32 << 20),
                         int(0.9 * vmem_cap)))

    cost = pl.CostEstimate(
        flops=int(6 * B * C * N),
        transcendentals=int(B * C * N),
        bytes_accessed=int(B * C * N * in_item + B * N * t_item + P * 4))

    kernel = _make_tp_kernel(N, tile_n, S, needs_mask)

    tp_parts = pl.pallas_call(
        kernel,
        out_shape=jax.ShapeDtypeStruct((P, 1), jnp.float32),
        grid_spec=pltpu.PrefetchScalarGridSpec(
            num_scalar_prefetch=0,
            grid=(P, S),
            in_specs=[
                pl.BlockSpec((B, C, tile_n), lambda p, s: (0, 0, p * S + s)),
                pl.BlockSpec((B, tile_n), lambda p, s: (0, p * S + s)),
            ],
            out_specs=pl.BlockSpec((1, 1), lambda p, s: (p, 0),
                                   memory_space=pltpu.MemorySpace.SMEM),
            scratch_shapes=[pltpu.VMEM((B, tile_n), jnp.float32)],
        ),
        compiler_params=pltpu.CompilerParams(
            dimension_semantics=("parallel", "arbitrary"),
            vmem_limit_bytes=vmem_limit),
        cost_estimate=cost,
    )(x, t)

    tp = jnp.sum(tp_parts)
    total = jnp.float32(B * N)
    # softmax rows sum to 1 over C and one-hot rows sum to 1 per pixel, so:
    #   FP = sum(preds) - TP = total - TP,  FN = sum(onehot) - TP = total - TP
    fp = total - tp
    fn = total - tp
    tversky = 1.0 - (tp + epsilon) / (tp + alpha * fp + beta * fn + epsilon)
    return tversky ** gamma


def _reference(logits, targets, *, alpha=0.3, beta=0.7, gamma=4.0 / 3.0,
               epsilon=1.0):
    B, C, H, W = logits.shape
    preds = jax.nn.softmax(logits.astype(jnp.float32), axis=1).reshape(B, C, -1)
    onehot = jax.nn.one_hot(targets.reshape(B, -1), C, axis=-1,
                            dtype=jnp.float32).transpose(0, 2, 1)
    tp = jnp.sum(preds * onehot)
    fp = jnp.sum((1.0 - onehot) * preds)
    fn = jnp.sum(onehot * (1.0 - preds))
    tversky = 1.0 - (tp + epsilon) / (tp + alpha * fp + beta * fn + epsilon)
    return tversky ** gamma


if __name__ == "__main__":
    key = jax.random.PRNGKey(0)
    k_logits, k_targets = jax.random.split(key)

    B, C, H, W = 2, 4, 16, 16
    logits = jax.random.normal(k_logits, (B, C, H, W), dtype=jnp.float32)
    targets = jax.random.randint(k_targets, (B, H, W), 0, C, dtype=jnp.int32)

    loss = focal_tversky_loss(logits, targets)
    loss = jax.block_until_ready(loss)

    ref = _reference(logits, targets)
    assert jnp.allclose(loss, ref, rtol=1e-5, atol=1e-6), (loss, ref)

    print("KERNEL_OK")
</pallas_src>

<mosaic_0001>
module attributes {stable_mosaic.version = 11 : i64} {
  func.func @kernel(%arg0: i32, %arg1: i32, %arg2: memref<2x4x256xf32, #tpu.memory_space<vmem>>, %arg3: memref<2x256xi32, #tpu.memory_space<vmem>>, %arg4: memref<1x1xf32, #tpu.memory_space<smem>>, %arg5: memref<2x256xf32, #tpu.memory_space<vmem>>) attributes {dimension_semantics = [#tpu.dimension_semantics<parallel>, #tpu.dimension_semantics<arbitrary>], iteration_bounds = array<i64: 1, 1>, scalar_prefetch = 0 : i64, scratch_operands = 1 : i64, tpu.core_type = #tpu.core_type<tc>, window_params = [{transform_indices = @transform_0, window_bounds = array<i64: 2, 4, 256>}, {transform_indices = @transform_1, window_bounds = array<i64: 2, 256>}, {transform_indices = @transform_2, window_bounds = array<i64: 1, 1>}]} {
    %c0_i32 = arith.constant 0 : i32
    %0 = arith.cmpi eq, %arg1, %c0_i32 : i32
    %1 = arith.extui %0 : i1 to i32
    %c0_i32_0 = arith.constant 0 : i32
    %2 = arith.cmpi ne, %1, %c0_i32_0 : i32
    scf.if %2 {
      %cst_14 = arith.constant 0.000000e+00 : f32
      %26 = vector.broadcast %cst_14 : f32 to vector<2x256xf32>
      %c0_15 = arith.constant 0 : index
      %c0_16 = arith.constant 0 : index
      %27 = vector.load %arg5[%c0_15, %c0_16] : memref<2x256xf32, #tpu.memory_space<vmem>>, vector<2x256xf32>
      tpu.vector_store %arg5[%c0_15, %c0_16], %26 {strides = array<i32>} : memref<2x256xf32, #tpu.memory_space<vmem>>, vector<2x256xf32>,
    } else {
    }
    %c0 = arith.constant 0 : index
    %c0_1 = arith.constant 0 : index
    %c0_2 = arith.constant 0 : index
    %3 = vector.load %arg2[%c0, %c0_1, %c0_2] : memref<2x4x256xf32, #tpu.memory_space<vmem>>, vector<2x4x256xf32>
    %cst = arith.constant dense<0xFF800000> : vector<2x256xf32>
    %4 = vector.multi_reduction <maximumf>, %3, %cst [1] : vector<2x4x256xf32> to vector<2x256xf32>
    %5 = vector.shape_cast %4 : vector<2x256xf32> to vector<2x1x256xf32>
    %6 = vector.broadcast %5 : vector<2x1x256xf32> to vector<2x4x256xf32>
    %7 = arith.subf %3, %6 : vector<2x4x256xf32>
    %8 = math.exp %7 : vector<2x4x256xf32>
    %cst_3 = arith.constant dense<0.000000e+00> : vector<2x256xf32>
    %9 = vector.multi_reduction <add>, %8, %cst_3 [1] : vector<2x4x256xf32> to vector<2x256xf32>
    %c0_4 = arith.constant 0 : index
    %c0_5 = arith.constant 0 : index
    %10 = vector.load %arg3[%c0_4, %c0_5] : memref<2x256xi32, #tpu.memory_space<vmem>>, vector<2x256xi32>
    %11 = tpu.iota {dimensions = array<i32: 1>} : vector<1x4x256xi32>
    %12 = vector.shape_cast %10 : vector<2x256xi32> to vector<2x1x256xi32>
    %13 = vector.broadcast %12 : vector<2x1x256xi32> to vector<2x4x256xi32>
    %14 = vector.broadcast %11 : vector<1x4x256xi32> to vector<2x4x256xi32>
    %15 = arith.cmpi eq, %13, %14 : vector<2x4x256xi32>
    %cst_6 = arith.constant 0.000000e+00 : f32
    %16 = vector.broadcast %cst_6 : f32 to vector<2x4x256xf32>
    %17 = arith.select %15, %8, %16 : vector<2x4x256xi1>, vector<2x4x256xf32>
    %cst_7 = arith.constant dense<0.000000e+00> : vector<2x256xf32>
    %18 = vector.multi_reduction <add>, %17, %cst_7 [1] : vector<2x4x256xf32> to vector<2x256xf32>
    %19 = arith.divf %18, %9 : vector<2x256xf32>
    %c0_8 = arith.constant 0 : index
    %c0_9 = arith.constant 0 : index
    %20 = vector.load %arg5[%c0_8, %c0_9] : memref<2x256xf32, #tpu.memory_space<vmem>>, vector<2x256xf32>
    %21 = arith.addf %20, %19 : vector<2x256xf32>
    %c0_10 = arith.constant 0 : index
    %c0_11 = arith.constant 0 : index
    %22 = vector.load %arg5[%c0_10, %c0_11] : memref<2x256xf32, #tpu.memory_space<vmem>>, vector<2x256xf32>
    tpu.vector_store %arg5[%c0_10, %c0_11], %21 {strides = array<i32>} : memref<2x256xf32, #tpu.memory_space<vmem>>, vector<2x256xf32>,
    %c0_i32_12 = arith.constant 0 : i32
    %23 = arith.cmpi eq, %arg1, %c0_i32_12 : i32
    %24 = arith.extui %23 : i1 to i32
    %c0_i32_13 = arith.constant 0 : i32
    %25 = arith.cmpi ne, %24, %c0_i32_13 : i32
    scf.if %25 {
      %c0_14 = arith.constant 0 : index
      %c0_15 = arith.constant 0 : index
      %26 = vector.load %arg5[%c0_14, %c0_15] : memref<2x256xf32, #tpu.memory_space<vmem>>, vector<2x256xf32>
      %27 = vector.shape_cast %26 : vector<2x256xf32> to vector<1x2x256xf32>
      %cst_16 = arith.constant dense<0.000000e+00> : vector<1xf32>
      %28 = vector.multi_reduction <add>, %27, %cst_16 [1, 2] : vector<1x2x256xf32> to vector<1xf32>
      %29 = vector.shape_cast %28 : vector<1xf32> to vector<1x1x1xf32>
      %30 = vector.extract %29[0, 0, 0] : f32 from vector<1x1x1xf32>
      %c0_17 = arith.constant 0 : index
      %c0_18 = arith.constant 0 : index
      %31 = memref.load %arg4[%c0_17, %c0_18] : memref<1x1xf32, #tpu.memory_space<smem>>
      memref.store %30, %arg4[%c0_17, %c0_18] : memref<1x1xf32, #tpu.memory_space<smem>>
    } else {
    }
    return
  }
  func.func @transform_0(%arg0: i32, %arg1: i32) -> (i32, i32, i32) {
    %c1_i32 = arith.constant 1 : i32
    %0 = arith.muli %arg0, %c1_i32 : i32
    %1 = arith.addi %0, %arg1 : i32
    %c0_i32 = arith.constant 0 : i32
    %c0_i32_0 = arith.constant 0 : i32
    %c0_i32_1 = arith.constant 0 : i32
    return %c0_i32, %c0_i32_0, %1 : i32, i32, i32
  }
  func.func @transform_1(%arg0: i32, %arg1: i32) -> (i32, i32) {
    %c1_i32 = arith.constant 1 : i32
    %0 = arith.muli %arg0, %c1_i32 : i32
    %1 = arith.addi %0, %arg1 : i32
    %c0_i32 = arith.constant 0 : i32
    %c0_i32_0 = arith.constant 0 : i32
    return %c0_i32, %1 : i32, i32
  }
  func.func @transform_2(%arg0: i32, %arg1: i32) -> (i32, i32) {
    %c0_i32 = arith.constant 0 : i32
    %c0_i32_0 = arith.constant 0 : i32
    return %arg0, %c0_i32 : i32, i32
  }
}

</mosaic_0001>

<bundles_post_ra>
// kernel: tpu_custom_call.1
= control target key start
LH: loop header
LB: loop body
LE: loop exit
PB: predicated region body
PF: predicated region fallthrough
CT: control target
= control target key end

     0   :  { %7 = vsyncpa [#allocation4], 0  ;;  %s457_s0 = inlined_call_operand.hbm [shape: f32[2,4,256], index: 0, kind: input, shape index: {}]   ;;  %s458_s1 = inlined_call_operand.hbm [shape: s32[2,256], index: 1, kind: input, shape index: {}]   ;;  %s459_s2 = inlined_call_operand.hbm [shape: f32[1,1], index: 2, kind: output, shape index: {}]  }
   0x1   :  { %8 = vsyncpa [#allocation7], 0 }
   0x2   :  { %9 = vsyncpa [#allocation5], 0  ;;  %s378_s9 = smov [#allocation3]   ;;  %s318_s13 = scalar_lea.hbm %s457_s0, 256 }
   0x3   :  { %s19_s10 = sshll.u32 %s378_s9, 4  ;;  %p319_p0 = scmp.ne.s32.totalorder %s457_s0, %s318_s13  ;;  %s20_s10 = int_to_ptr.vmem [resolvable:$true] %s19_s10 }
   0x4   :  { %p322_p1 = scmp.lt.u32.totalorder %s318_s13, %s457_s0 }
   0x6   :  { %p324_p2 = pnand %p322_p1, %p319_p0 }
   0x8   :  { %327 = shalt.err (!%p324_p2)
}
   0x9   :  { %s328_s18 = scalar_lea.vmem %s20_s10, 256  ;;  %p333_p4 = scmp.lt.s32.totalorder %s20_s10, %s20_s10 }
   0xa   :  { %p329_p3 = scmp.ne.s32.totalorder %s20_s10, %s328_s18  ;;  %p334_p5 = scmp.lt.s32.totalorder %s328_s18, %s328_s18 }
   0xc   :  { %p335_p6 = por %p334_p5, %p333_p4 }
   0xe   :  { %p336_p7 = pnand %p335_p6, %p329_p3 }
  0x10   :  { %339 = shalt.err (!%p336_p7)
}
  0x11   :  { %s379_s19 = smov 128   ;;  %s380_s20 = smov 8  }
  0x12   :  { %25 = dma.hbm_to_vmem [thread:$0]  %s457_s0, 256, %s20_s10, [#allocation4], %s379_s19, %s379_s19, %s380_s20  }
  0x13   :  { %s381_s23 = smov [#allocation6]   ;;  %s340_s27 = scalar_lea.hbm %s458_s1, 64 }
  0x14   :  { %s36_s24 = sshll.u32 %s381_s23, 4  ;;  %p341_p8 = scmp.ne.s32.totalorder %s458_s1, %s340_s27  ;;  %s37_s24 = int_to_ptr.vmem [resolvable:$true] %s36_s24 }
  0x15   :  { %p344_p9 = scmp.lt.u32.totalorder %s340_s27, %s458_s1 }
  0x17   :  { %p346_p10 = pnand %p344_p9, %p341_p8 }
  0x19   :  { %349 = shalt.err (!%p346_p10)
}
  0x1a   :  { %s350_s4 = scalar_lea.vmem %s37_s24, 64  ;;  %p355_p12 = scmp.lt.s32.totalorder %s37_s24, %s37_s24 }
  0x1b   :  { %p351_p11 = scmp.ne.s32.totalorder %s37_s24, %s350_s4  ;;  %p356_p13 = scmp.lt.s32.totalorder %s350_s4, %s350_s4 }
  0x1d   :  { %p357_p0 = por %p356_p13, %p355_p12 }
  0x1f   :  { %p358_p1 = pnand %p357_p0, %p351_p11 }
  0x21   :  { %361 = shalt.err (!%p358_p1)
}
  0x22   :  { %39 = dma.hbm_to_vmem [thread:$0]  %s458_s1, 64, %s37_s24, [#allocation7]  }
  0x23   :  { %372 = dma.done.wait [#allocation4], 256  }
  0x24   :  { %373 = vsyncadd [#allocation4], 4294967040 }
  0x25   :  { %374 = dma.done.wait [#allocation7], 64  }
  0x26   :  { %375 = vsyncadd [#allocation7], 4294967232  ;;  %v382_v0 = vmov 0.0   ;;  %vm63_vm0 = vcmask 1043456   ;;  %v55_v1 = vld [vmem:[#allocation3] sm:$0xff]  ;;  %v56_v2 = vld [vmem:[#allocation3 + $0x8] sm:$0xff]  ;;  %v141_v33 = vlaneseq }
  0x27   :  { %54 = vst [vmem:[#allocation2] sm:$0xf] %v382_v0  ;;  %v59_v3 = vcombine.high %v55_v1, %v55_v1  ;;  %v60_v4 = vcombine.high %v56_v2, %v56_v2  ;;  %v64_v5 = vsel %vm63_vm0, %v55_v1, -inf  ;;  %v78_v6 = vsel %vm63_vm0, %v56_v2, -inf  ;;  %s362_s8 = scalar_lea.hbm %s459_s2, 16 }
  0x28   :  { %v65_v7 = vrot.slane %v64_v5, 4  ;;  %v79_v8 = vrot.slane %v78_v6, 4  ;;  %v293_v38 = vld.sshfl [vmem:[#allocation6] sm:$0x33 pattern:$0x75316420]  ;;  %p363_p2 = scmp.ne.s32.totalorder %s459_s2, %s362_s8  ;;  %p366_p3 = scmp.lt.u32.totalorder %s362_s8, %s459_s2 }
  0x29   :  { %v71_v9 = vsel %vm63_vm0, %v59_v3, -inf  ;;  %v85_v10 = vsel %vm63_vm0, %v60_v4, -inf  ;;  %v428_v39 = vshrl.u32 %v141_v33, 7  ;;  %v150_v42 = vcombine.high %v293_v38, %v293_v38 }
  0x2a   :  { %v66_v11 = vmax.f32 %v64_v5, %v65_v7  ;;  %v72_v12 = vrot.slane %v71_v9, 4  ;;  %v80_v13 = vmax.f32 %v78_v6, %v79_v8  ;;  %v86_v14 = vrot.slane %v85_v10, 4  ;;  %p368_p4 = pnand %p366_p3, %p363_p2 }
  0x2b   :  { %v153_v43 = vsub.s32 0, %v428_v39  ;;  %v157_v44 = vsub.s32 1, %v428_v39  ;;  %vm237_vm5 = vcmask 1041409   ;;  %vm239_vm6 = vcmask 1043459  }
  0x2c   :  { %v67_v15 = vrot.slane %v66_v11, 2  ;;  %v73_v16 = vmax.f32 %v71_v9, %v72_v12  ;;  %v81_v17 = vrot.slane %v80_v13, 2  ;;  %v87_v18 = vmax.f32 %v85_v10, %v86_v14 }
  0x2d   :  { %v154_v45 = vrot.slane %v293_v38, %v153_v43  ;;  %v162_v46 = vrot.slane %v150_v42, %v153_v43  ;;  %v158_v47 = vrot.slane %v293_v38, %v157_v44  ;;  %v166_v48 = vrot.slane %v150_v42, %v157_v44 }
  0x2e   :  { %v68_v19 = vmax.f32 %v66_v11, %v67_v15  ;;  %v74_v20 = vrot.slane %v73_v16, 2  ;;  %v82_v21 = vmax.f32 %v80_v13, %v81_v17  ;;  %v88_v22 = vrot.slane %v87_v18, 2 }
  0x2f   :  { %vm167_vm1 = vcmp.eq.s32.totalorder %v154_v45, %v428_v39  ;;  %vm169_vm2 = vcmp.eq.s32.totalorder %v162_v46, %v428_v39  ;;  %vm168_vm3 = vcmp.eq.s32.totalorder %v158_v47, %v428_v39  ;;  %vm170_vm4 = vcmp.eq.s32.totalorder %v166_v48, %v428_v39 }
  0x30   :  { %v69_v23 = vrot.slane %v68_v19, 1  ;;  %v75_v24 = vmax.f32 %v73_v16, %v74_v20  ;;  %v83_v25 = vrot.slane %v82_v21, 1  ;;  %v89_v26 = vmax.f32 %v87_v18, %v88_v22 }
  0x31   :  { %v383_v46 = vmov 1983009808   ;;  %vm241_vm7 = vcmask 1045509   ;;  %vm243_vm8 = vcmask 1047559   ;;  %vm263_vm9 = vcmask 1041408  }
  0x32   :  { %v70_v27 = vmax.f32 %v68_v19, %v69_v23  ;;  %v76_v28 = vrot.slane %v75_v24, 1  ;;  %v84_v29 = vmax.f32 %v82_v21, %v83_v25  ;;  %v90_v30 = vrot.slane %v89_v26, 1 }
  0x33   :  { %v218_v47 = vunpack.c.l.s4 %v383_v46 }
  0x34   :  { %v77_v31 = vmax.f32 %v75_v24, %v76_v28  ;;  %v91_v32 = vmax.f32 %v89_v26, %v90_v30 }
  0x36   :  { %v96_v34 = vcombine.low %v70_v27, %v77_v31  ;;  %v97_v35 = vcombine.low %v84_v29, %v91_v32 }
  0x38   :  { %v100_v36 = vsub.f32 %v55_v1, %v96_v34  ;;  %v101_v37 = vsub.f32 %v56_v2, %v97_v35 }
  0x3a   :  { %v102_v40 = vmul.f32 1.442695, %v100_v36  ;;  %v104_v41 = vmul.f32 1.442695, %v101_v37 }
  0x3c   :  { %306 = vpow2.f32 %v102_v40 }
  0x3d   :  { %308 = vpow2.f32 %v104_v41 }
  0x46   :  { %v307_v49 = vpop.eup %306 }
  0x47   :  { %v309_v50 = vpop.eup %308  ;;  %v108_v51 = vcombine.high %v307_v49, %v307_v49  ;;  %v112_v52 = vsel %vm63_vm0, %v307_v49, 0.0  ;;  %v171_v53 = vsel %vm167_vm1, %v307_v49, 0.0 }
  0x48   :  { %v109_v54 = vcombine.high %v309_v50, %v309_v50  ;;  %v113_v55 = vrot.slane %v112_v52, 4  ;;  %v126_v56 = vsel %vm63_vm0, %v309_v50, 0.0  ;;  %v173_v57 = vsel %vm169_vm2, %v309_v50, 0.0 }
  0x49   :  { %v119_v58 = vsel %vm63_vm0, %v108_v51, 0.0  ;;  %v127_v59 = vrot.slane %v126_v56, 4  ;;  %v172_v60 = vsel %vm168_vm3, %v108_v51, 0.0  ;;  %v175_v61 = vsel %vm63_vm0, %v171_v53, 0.0 }
  0x4a   :  { %v114_v62 = vadd.f32 %v113_v55, %v112_v52  ;;  %v120_v63 = vrot.slane %v119_v58, 4  ;;  %v133_v0 = vsel %vm63_vm0, %v109_v54, 0.0  ;;  %v174_v1 = vsel %vm170_vm4, %v109_v54, 0.0 }
  0x4b   :  { %v128_v2 = vadd.f32 %v127_v59, %v126_v56  ;;  %v134_v3 = vrot.slane %v133_v0, 4  ;;  %v176_v4 = vrot.slane %v175_v61, 4  ;;  %v182_v5 = vsel %vm63_vm0, %v172_v60, 0.0 }
  0x4c   :  { %v115_v6 = vrot.slane %v114_v62, 2  ;;  %v121_v7 = vadd.f32 %v120_v63, %v119_v58  ;;  %v183_v8 = vrot.slane %v182_v5, 4  ;;  %v189_v9 = vsel %vm63_vm0, %v173_v57, 0.0 }
  0x4d   :  { %v129_v10 = vrot.slane %v128_v2, 2  ;;  %v135_v11 = vadd.f32 %v134_v3, %v133_v0  ;;  %v177_v12 = vadd.f32 %v176_v4, %v175_v61  ;;  %v190_v13 = vrot.slane %v189_v9, 4  ;;  %v211_v4 = vld [vmem:[#allocation2] sm:$0xf] }
  0x4e   :  { %v116_v14 = vadd.f32 %v115_v6, %v114_v62  ;;  %v122_v15 = vrot.slane %v121_v7, 2  ;;  %v184_v16 = vadd.f32 %v183_v8, %v182_v5  ;;  %v196_v17 = vsel %vm63_vm0, %v174_v1, 0.0 }
  0x4f   :  { %v130_v18 = vadd.f32 %v129_v10, %v128_v2  ;;  %v136_v19 = vrot.slane %v135_v11, 2  ;;  %v178_v20 = vrot.slane %v177_v12, 2  ;;  %v191_v21 = vadd.f32 %v190_v13, %v189_v9 }
  0x50   :  { %v117_v22 = vrot.slane %v116_v14, 1  ;;  %v123_v23 = vadd.f32 %v122_v15, %v121_v7  ;;  %v197_v24 = vrot.slane %v196_v17, 4  ;;  %v185_v27 = vrot.slane %v184_v16, 2 }
  0x51   :  { %v131_v25 = vrot.slane %v130_v18, 1  ;;  %v137_v26 = vadd.f32 %v136_v19, %v135_v11  ;;  %v192_v28 = vrot.slane %v191_v21, 2  ;;  %v179_v34 = vadd.f32 %v178_v20, %v177_v12 }
  0x52   :  { %v118_v29 = vadd.f32 %v117_v22, %v116_v14  ;;  %v124_v30 = vrot.slane %v123_v23, 1  ;;  %v198_v31 = vadd.f32 %v197_v24, %v196_v17  ;;  %v186_v40 = vadd.f32 %v185_v27, %v184_v16 }
  0x53   :  { %v132_v32 = vadd.f32 %v131_v25, %v130_v18  ;;  %v138_v33 = vrot.slane %v137_v26, 1  ;;  %v193_v36 = vadd.f32 %v192_v28, %v191_v21  ;;  %v180_v42 = vrot.slane %v179_v34, 1 }
  0x54   :  { %v125_v35 = vadd.f32 %v124_v30, %v123_v23  ;;  %v199_v37 = vrot.slane %v198_v31, 2  ;;  %310 = vrcp.f32 %v118_v29  ;;  %v187_v44 = vrot.slane %v186_v40, 1 }
  0x55   :  { %v139_v38 = vadd.f32 %v138_v33, %v137_v26  ;;  %312 = vrcp.f32 %v132_v32  ;;  %v194_v43 = vrot.slane %v193_v36, 1  ;;  %v181_v48 = vadd.f32 %v180_v42, %v179_v34 }
  0x56   :  { %v200_v41 = vadd.f32 %v199_v37, %v198_v31  ;;  %314 = vrcp.f32 %v125_v35  ;;  %v188_v50 = vadd.f32 %v187_v44, %v186_v40  ;;  %v219_v53 = vunpack.c.0.s8 %v218_v47 }
  0x57   :  { %316 = vrcp.f32 %v139_v38  ;;  %v195_v49 = vadd.f32 %v194_v43, %v193_v36 }
  0x58   :  { %v201_v45 = vrot.slane %v200_v41, 1  ;;  %v222_v61 = vsub.s32 %v219_v53, %v428_v39 }
  0x5a   :  { %v202_v52 = vadd.f32 %v201_v45, %v200_v41 }
  0x5e   :  { %v311_v51 = vpop.eup %310 }
  0x5f   :  { %v313_v54 = vpop.eup %312  ;;  %v204_v55 = vmul.f32 %v311_v51, %v181_v48 }
  0x60   :  { %v315_v56 = vpop.eup %314  ;;  %v208_v57 = vmul.f32 %v313_v54, %v195_v49 }
  0x61   :  { %v317_v58 = vpop.eup %316  ;;  %v206_v59 = vmul.f32 %v315_v56, %v188_v50 }
  0x62   :  { %v210_v60 = vmul.f32 %v317_v58, %v202_v52 }
  0x63   :  { %v216_v62 = vcombine.low %v204_v55, %v206_v59 }
  0x64   :  { %v224_v63 = vcombine.low %v208_v57, %v210_v60 }
  0x65   :  { %v223_v0 = vrot.slane %v216_v62, %v222_v61 }
  0x66   :  { %v231_v1 = vrot.slane %v224_v63, %v222_v61 }
  0x68   :  { %v236_v2 = vrot.slane %v231_v1, 7 }
  0x6a   :  { %v238_v3 = vsel %vm237_vm5, %v236_v2, %v223_v0 }
  0x6b   :  { %v240_v5 = vsel %vm239_vm6, %v236_v2, %v238_v3 }
  0x6c   :  { %v242_v6 = vsel %vm241_vm7, %v236_v2, %v240_v5 }
  0x6d   :  { %v244_v7 = vsel %vm243_vm8, %v236_v2, %v242_v6 }
  0x6e   :  { %v246_v8 = vadd.f32 %v244_v7, %v211_v4 }
  0x70   :  { %247 = vst [vmem:[#allocation2] sm:$0xf] %v246_v8 }
  0x77   :  { %v294_v9 = vld.sshfl [vmem:[#allocation2] sm:$0x33 pattern:$0x76325410] }
  0x78   :  { %v260_v10 = vcombine.high %v294_v9, %v294_v9  ;;  %v264_v39 = vsel %vm263_vm9, %v294_v9, 0.0 }
  0x7a   :  { %v265_v11 = vsel %vm263_vm9, %v260_v10, 0.0 }
  0x7b   :  { %v266_v12 = vadd.f32 %v265_v11, %v264_v39 }
  0x7d   :  { %267 = vadd.xlane.f32.xlu0 %v266_v12 }
 0x10a   :  { %v268_v13 = vpop.xlane.xlu0 %267 }
 0x10b   :  { %v269_v14 = vrot.slane %v268_v13, 4 }
 0x10d   :  { %v270_v15 = vadd.f32 %v269_v14, %v268_v13 }
 0x10f   :  { %v271_v16 = vrot.slane %v270_v15, 2 }
 0x111   :  { %v272_v17 = vadd.f32 %v271_v16, %v270_v15 }
 0x113   :  { %v273_v18 = vrot.slane %v272_v17, 1 }
 0x115   :  { %v274_v19 = vadd.f32 %v273_v18, %v272_v17 }
 0x117   :  { %295 = vpush %v274_v19 }
 0x148   :  { %s296_s1 = spop %295 }
 0x149   :  { %277 = sst [smem:[#allocation8]] %s296_s1 }
 0x14a   :  { %371 = shalt.err (!%p368_p4)
}
 0x14b   :  { %s384_s13 = smov [#allocation8]  }
 0x14c   :  { %285 = dma.smem_to_hbm %s384_s13, 16, %s459_s2, [#allocation5]  }
 0x14d   :  { %376 = dma.done.wait [#allocation5], 16  }
 0x14e   :  { %377 = vsyncadd [#allocation5], 4294967280 }
 0x14f   :  { %289 = sfence }
 0x150   :  { %290 = vsyncpa [#allocation4], 1 }
 0x151   :  { %291 = vsyncpa [#allocation7], 1 }
 0x152   :  { %292 = vsyncpa [#allocation5], 1 }

</bundles_post_ra>
